<compile_context>
chip_gen: v6e
topology: v6e:2x2x1
jax: 0.10.0
libtpu: 0.0.40
codegen_flags: <defaults>
</compile_context>

<pallas_src>
import functools

import numpy as np
import jax
import jax.numpy as jnp
from jax import lax
from jax.experimental import pallas as pl
from jax.experimental.pallas import tpu as pltpu


def _round_up(x, m):
    return ((x + m - 1) // m) * m


# ---------------------------------------------------------------------------
# Pallas kernels: y = maybe_relu(x @ w + b), bf16 inputs, f32 accumulation.
# ---------------------------------------------------------------------------
def _mm_kernel_single(x_ref, w_ref, b_ref, o_ref, *, relu):
    # Single K step: no accumulator scratch, no pl.when gates, direct write.
    y = jnp.dot(x_ref[...], w_ref[...], preferred_element_type=jnp.float32)
    y = y + b_ref[...]
    if relu:
        y = jnp.maximum(y, 0.0)
    o_ref[...] = y.astype(o_ref.dtype)


def _mm_kernel_acc(x_ref, w_ref, b_ref, o_ref, acc_ref, *, relu):
    # Multi-K-step: accumulate in a VMEM f32 scratch across the K grid axis.
    k = pl.program_id(1)

    @pl.when(k == 0)
    def _():
        acc_ref[...] = jnp.zeros_like(acc_ref)

    acc_ref[...] += jnp.dot(x_ref[...], w_ref[...],
                            preferred_element_type=jnp.float32)

    @pl.when(k == pl.num_programs(1) - 1)
    def _():
        y = acc_ref[...] + b_ref[...]
        if relu:
            y = jnp.maximum(y, 0.0)
        o_ref[...] = y.astype(o_ref.dtype)


_MAX_W_BLOCK_BYTES = 5 * 1024 * 1024   # bf16 weight block budget (double-buffered ~10MB)
_VMEM_LIMIT_BYTES = 48 * 1024 * 1024   # explicit budget: fits v7x 64MiB, v5e/v6e 128MiB


def _choose_tiles(Kp, Np):
    # N tile: keep >=2 N tiles for large-N (FC) layers so megacore can shard them.
    if Np <= 1024 or (Np % 1024) != 0:
        tn = Np
    else:
        tn = 1024
    # K tile: largest divisor of Kp that is a multiple of 128 and whose bf16
    # weight block fits the budget.  Convs / FC3 end up single-K-step.
    tk = 128
    for d in range(1, Kp // 128 + 1):
        if Kp % d:
            continue
        cand = Kp // d
        if cand % 128:
            continue
        if cand * tn * 2 <= _MAX_W_BLOCK_BYTES:
            tk = cand
            break
    return tn, tk


def pallas_matmul_bias(x, w_pad, b_pad, n_out, *, relu):
    """y = maybe_relu(x @ w + b).

    x:     (M, K)  float32/bf16 activations (cast to bf16 + padded here, cheap).
    w_pad: (Kp, Np) bfloat16, pre-padded to multiples of 128.
    b_pad: (1, Np)  float32, pre-padded.
    Returns (M, n_out) float32.
    """
    M, K = x.shape
    Kp, Np = w_pad.shape
    assert Kp >= K and b_pad.shape == (1, Np)

    tn, tk = _choose_tiles(Kp, Np)
    Mp = _round_up(M, 16)                                   # bf16 sublane multiple
    xp = jnp.pad(x.astype(jnp.bfloat16), ((0, Mp - M), (0, Kp - K)))
    nt, kt = Np // tn, Kp // tk

    if kt == 1:
        out = pl.pallas_call(
            functools.partial(_mm_kernel_single, relu=relu),
            out_shape=jax.ShapeDtypeStruct((Mp, Np), jnp.float32),
            grid_spec=pltpu.PrefetchScalarGridSpec(
                num_scalar_prefetch=0,
                grid=(nt,),
                in_specs=[
                    pl.BlockSpec((Mp, Kp), lambda j: (0, 0)),   # activations
                    pl.BlockSpec((Kp, tn), lambda j: (0, j)),   # weights
                    pl.BlockSpec((1, tn), lambda j: (0, j)),    # bias
                ],
                out_specs=pl.BlockSpec((Mp, tn), lambda j: (0, j)),
            ),
            compiler_params=pltpu.CompilerParams(
                dimension_semantics=("parallel",),
                vmem_limit_bytes=_VMEM_LIMIT_BYTES),
        )(xp, w_pad, b_pad)
    else:
        out = pl.pallas_call(
            functools.partial(_mm_kernel_acc, relu=relu),
            out_shape=jax.ShapeDtypeStruct((Mp, Np), jnp.float32),
            grid_spec=pltpu.PrefetchScalarGridSpec(
                num_scalar_prefetch=0,
                grid=(nt, kt),
                in_specs=[
                    pl.BlockSpec((Mp, tk), lambda j, k: (0, k)),
                    pl.BlockSpec((tk, tn), lambda j, k: (k, j)),
                    pl.BlockSpec((1, tn), lambda j, k: (0, j)),
                ],
                out_specs=pl.BlockSpec((Mp, tn), lambda j, k: (0, j)),
                scratch_shapes=[pltpu.VMEM((Mp, tn), jnp.float32)],
            ),
            compiler_params=pltpu.CompilerParams(
                dimension_semantics=("parallel", "arbitrary"),
                vmem_limit_bytes=_VMEM_LIMIT_BYTES),
        )(xp, w_pad, b_pad)
    return out[:M, :n_out]


# ---------------------------------------------------------------------------
# Conv = im2col (JAX glue) + Pallas matmul kernel above
# ---------------------------------------------------------------------------
def _im2col(x, kh, kw, stride, pad):
    # x: (B, H, W, C) -> (B*Ho*Wo, kh*kw*C), feature ordering (kh, kw, c)
    x = jnp.pad(x, ((0, 0), (pad, pad), (pad, pad), (0, 0)))
    B, Hp, Wp, C = x.shape
    Ho = (Hp - kh) // stride + 1
    Wo = (Wp - kw) // stride + 1
    cols = []
    for i in range(kh):
        for j in range(kw):
            cols.append(lax.slice(
                x, (0, i, j, 0),
                (B, i + stride * (Ho - 1) + 1, j + stride * (Wo - 1) + 1, C),
                (1, stride, stride, 1)))
    patches = jnp.stack(cols, axis=3)            # (B, Ho, Wo, kh*kw, C)
    return patches.reshape(B * Ho * Wo, kh * kw * C), (B, Ho, Wo)


def conv2d_relu(x, w_pad, b_pad, cfg, *, relu=True):
    k, stride, pad, cout = cfg["k"], cfg["stride"], cfg["pad"], cfg["cout"]
    patches, (B, Ho, Wo) = _im2col(x, k, k, stride, pad)
    y = pallas_matmul_bias(patches, w_pad, b_pad, cout, relu=relu)
    return y.reshape(B, Ho, Wo, cout)


def maxpool_3x3_s2(x):
    # nn.MaxPool2d(kernel_size=3, stride=2), floor mode, no padding. NHWC.
    return lax.reduce_window(
        x, jnp.array(-jnp.inf, x.dtype), lax.max,
        window_dimensions=(1, 3, 3, 1),
        window_strides=(1, 2, 2, 1),
        padding="VALID")


def _pool_matrix(in_size, out_size):
    # PyTorch AdaptiveAvgPool bin edges as an averaging matrix (out, in).
    m = np.zeros((out_size, in_size), np.float32)
    for i in range(out_size):
        s = (i * in_size) // out_size
        e = -(-((i + 1) * in_size) // out_size)
        m[i, s:e] = 1.0 / (e - s)
    return jnp.asarray(m)


def adaptive_avg_pool(x, out_h, out_w):
    # Exact PyTorch AdaptiveAvgPool2d semantics, NHWC, few XLA ops.
    B, H, W, C = x.shape
    if H == 1 and W == 1:
        return jnp.broadcast_to(x, (B, out_h, out_w, C))
    y = jnp.einsum("oh,bhwc->bowc", _pool_matrix(H, out_h), x)
    y = jnp.einsum("pw,bowc->bopc", _pool_matrix(W, out_w), y)
    return y


# ---------------------------------------------------------------------------
# Parameters (deterministic synthetic init, PyTorch shapes from LocalAlexNet)
# ---------------------------------------------------------------------------
def init_params(key, num_classes=4):
    def conv(k, cout, cin, kh, kw):
        k1, k2 = jax.random.split(k)
        fan_in = cin * kh * kw
        w = jax.random.normal(k1, (cout, cin, kh, kw), jnp.float32) / jnp.sqrt(fan_in)
        b = 0.01 * jax.random.normal(k2, (cout,), jnp.float32)
        return w, b

    def linear(k, fin, fout):
        k1, k2 = jax.random.split(k)
        w = jax.random.normal(k1, (fin, fout), jnp.float32) / jnp.sqrt(fin)
        b = 0.01 * jax.random.normal(k2, (fout,), jnp.float32)
        return w, b

    keys = jax.random.split(key, 8)
    p = {}
    p["c1_w"], p["c1_b"] = conv(keys[0], 64, 1, 11, 11)
    p["c2_w"], p["c2_b"] = conv(keys[1], 192, 64, 5, 5)
    p["c3_w"], p["c3_b"] = conv(keys[2], 384, 192, 3, 3)
    p["c4_w"], p["c4_b"] = conv(keys[3], 256, 384, 3, 3)
    p["c5_w"], p["c5_b"] = conv(keys[4], 256, 256, 3, 3)
    p["fc1_w"], p["fc1_b"] = linear(keys[5], 256 * 6 * 6, 4096)
    p["fc2_w"], p["fc2_b"] = linear(keys[6], 4096, 4096)
    p["fc3_w"], p["fc3_b"] = linear(keys[7], 4096, num_classes)
    return p


def make_meta(num_classes=4):
    return {
        "c1": dict(cout=64, k=11, stride=4, pad=2),
        "c2": dict(cout=192, k=5, stride=1, pad=2),
        "c3": dict(cout=384, k=3, stride=1, pad=1),
        "c4": dict(cout=256, k=3, stride=1, pad=1),
        "c5": dict(cout=256, k=3, stride=1, pad=1),
        "fc1": dict(n=4096),
        "fc2": dict(n=4096),
        "fc3": dict(n=num_classes),
    }


def _pad_matmul_params(wmat, b):
    # (K, N) f32 weight + (N,) f32 bias -> bf16 padded weight, f32 padded bias.
    K, N = wmat.shape
    Kp, Np = _round_up(K, 128), _round_up(N, 128)
    w_pad = jnp.pad(wmat, ((0, Kp - K), (0, Np - N))).astype(jnp.bfloat16)
    b_pad = jnp.pad(b.astype(jnp.float32), (0, Np - N)).reshape(1, Np)
    return w_pad, b_pad


def prepare_params(p):
    """One-time (outside the jitted forward) layout prep: transpose conv weights
    to (KH*KW*Cin, Cout), permute fc1 rows to match NHWC flatten, pad to tiled
    shapes and cast weights to bf16 (biases stay f32)."""
    prep = {}
    for name in ("c1", "c2", "c3", "c4", "c5"):
        w_oihw, b = p[name + "_w"], p[name + "_b"]
        Cout, Cin, KH, KW = w_oihw.shape
        wmat = jnp.transpose(w_oihw, (2, 3, 1, 0)).reshape(KH * KW * Cin, Cout)
        prep[name + "_w"], prep[name + "_b"] = _pad_matmul_params(wmat, b)
    # fc1: rows indexed by PyTorch NCHW flatten (c,h,w); permute to NHWC (h,w,c)
    # so the forward pass can flatten NHWC directly (no transpose before FC1).
    C, H, W = 256, 6, 6
    perm = np.arange(C * H * W).reshape(C, H, W).transpose(1, 2, 0).reshape(-1)
    prep["fc1_w"], prep["fc1_b"] = _pad_matmul_params(p["fc1_w"][perm], p["fc1_b"])
    prep["fc2_w"], prep["fc2_b"] = _pad_matmul_params(p["fc2_w"], p["fc2_b"])
    prep["fc3_w"], prep["fc3_b"] = _pad_matmul_params(p["fc3_w"], p["fc3_b"])
    return prep


# ---------------------------------------------------------------------------
# Forward pass (matches LocalAlexNet.forward, inference mode)
# ---------------------------------------------------------------------------
def local_alexnet_forward(params, x_nchw, *, meta):
    x = jnp.transpose(x_nchw, (0, 2, 3, 1))                      # NCHW -> NHWC
    x = conv2d_relu(x, params["c1_w"], params["c1_b"], meta["c1"])
    x = maxpool_3x3_s2(x)
    x = conv2d_relu(x, params["c2_w"], params["c2_b"], meta["c2"])
    x = maxpool_3x3_s2(x)
    x = conv2d_relu(x, params["c3_w"], params["c3_b"], meta["c3"])
    x = conv2d_relu(x, params["c4_w"], params["c4_b"], meta["c4"])
    x = conv2d_relu(x, params["c5_w"], params["c5_b"], meta["c5"])
    x = maxpool_3x3_s2(x)
    x = adaptive_avg_pool(x, 6, 6)                               # (B, 6, 6, 256)
    x = x.reshape(x.shape[0], -1)   # NHWC flatten; fc1_w rows were pre-permuted
    # nn.Dropout layers are identity at inference (no-op here).
    x = pallas_matmul_bias(x, params["fc1_w"], params["fc1_b"],
                           meta["fc1"]["n"], relu=True)
    x = pallas_matmul_bias(x, params["fc2_w"], params["fc2_b"],
                           meta["fc2"]["n"], relu=True)
    x = pallas_matmul_bias(x, params["fc3_w"], params["fc3_b"],
                           meta["fc3"]["n"], relu=False)
    return x


if __name__ == "__main__":
    key = jax.random.PRNGKey(0)
    k_params, k_x, k_chk = jax.random.split(key, 3)

    # --- Pallas kernel self-checks vs plain-JAX bf16 references ---
    kx, kw, kb = jax.random.split(k_chk, 3)

    # single-K-step path
    xm = jax.random.normal(kx, (37, 200), jnp.float32)
    wm = jax.random.normal(kw, (200, 100), jnp.float32)
    bm = jax.random.normal(kb, (100,), jnp.float32)
    wp, bp = _pad_matmul_params(wm, bm)
    y_pl = pallas_matmul_bias(xm, wp, bp, 100, relu=True)
    y_ref = jnp.maximum(
        jnp.dot(xm.astype(jnp.bfloat16), wm.astype(jnp.bfloat16),
                preferred_element_type=jnp.float32) + bm, 0.0)
    assert jnp.allclose(y_pl, y_ref, atol=1e-2, rtol=1e-2), "single-step mismatch"

    # multi-K-step (accumulator) path
    xm2 = 0.1 * jax.random.normal(kx, (4, 5120), jnp.float32)
    wm2 = 0.1 * jax.random.normal(kw, (5120, 1024), jnp.float32)
    bm2 = jax.random.normal(kb, (1024,), jnp.float32)
    wp2, bp2 = _pad_matmul_params(wm2, bm2)
    y_pl2 = pallas_matmul_bias(xm2, wp2, bp2, 1024, relu=False)
    y_ref2 = jnp.dot(xm2.astype(jnp.bfloat16), wm2.astype(jnp.bfloat16),
                     preferred_element_type=jnp.float32) + bm2
    assert jnp.allclose(y_pl2, y_ref2, atol=1e-2, rtol=1e-2), "acc-step mismatch"

    # --- full forward ---
    meta = make_meta(num_classes=4)
    raw_params = init_params(k_params, num_classes=4)
    params = prepare_params(raw_params)      # one-time layout/pad/cast, outside jit

    # Small input consistent with the module: batch=2, 1 channel, 64x64 spatial.
    x = jax.random.normal(k_x, (2, 1, 64, 64), jnp.float32)

    fwd = jax.jit(functools.partial(local_alexnet_forward, meta=meta))
    out = fwd(params, x)
    jax.block_until_ready(out)
    assert out.shape == (2, 4), out.shape
    assert bool(jnp.all(jnp.isfinite(out)))
    print("KERNEL_OK")
</pallas_src>

<mosaic_0001>
module attributes {stable_mosaic.version = 11 : i64} {
  func.func @_mm_kernel_single(%arg0: i32, %arg1: memref<48x256xbf16, #tpu.memory_space<vmem>>, %arg2: memref<256x128xbf16, #tpu.memory_space<vmem>>, %arg3: memref<1x128xf32, #tpu.memory_space<vmem>>, %arg4: memref<48x128xf32, #tpu.memory_space<vmem>>) attributes {dimension_semantics = [#tpu.dimension_semantics<parallel>], iteration_bounds = array<i64: 1>, scalar_prefetch = 0 : i64, scratch_operands = 0 : i64, tpu.core_type = #tpu.core_type<tc>, window_params = [{pipeline_mode = #tpu.pipeline_mode<synchronous>, transform_indices = @transform_0, window_bounds = array<i64: 48, 256>}, {transform_indices = @transform_1, window_bounds = array<i64: 256, 128>}, {transform_indices = @transform_2, window_bounds = array<i64: 1, 128>}, {transform_indices = @transform_3, window_bounds = array<i64: 48, 128>}]} {
    %c0 = arith.constant 0 : index
    %c0_0 = arith.constant 0 : index
    %0 = vector.load %arg1[%c0, %c0_0] : memref<48x256xbf16, #tpu.memory_space<vmem>>, vector<48x256xbf16>
    %c0_1 = arith.constant 0 : index
    %c0_2 = arith.constant 0 : index
    %1 = vector.load %arg2[%c0_1, %c0_2] : memref<256x128xbf16, #tpu.memory_space<vmem>>, vector<256x128xbf16>
    %cst = arith.constant dense<0.000000e+00> : vector<48x128xf32>
    %2 = tpu.matmul %0, %1, %cst {dimension_numbers = #tpu.dot_dimension_numbers<[1], [0], [0], [1], [0, 0, 1, 1], [], []>} : vector<48x256xbf16>, vector<256x128xbf16>, vector<48x128xf32> -> vector<48x128xf32>
    %c0_3 = arith.constant 0 : index
    %c0_4 = arith.constant 0 : index
    %3 = vector.load %arg3[%c0_3, %c0_4] : memref<1x128xf32, #tpu.memory_space<vmem>>, vector<1x128xf32>
    %4 = vector.broadcast %3 : vector<1x128xf32> to vector<48x128xf32>
    %5 = arith.addf %2, %4 : vector<48x128xf32>
    %cst_5 = arith.constant 0.000000e+00 : f32
    %6 = vector.broadcast %cst_5 : f32 to vector<48x128xf32>
    %7 = arith.maximumf %5, %6 : vector<48x128xf32>
    %c0_6 = arith.constant 0 : index
    %c0_7 = arith.constant 0 : index
    %8 = vector.load %arg4[%c0_6, %c0_7] : memref<48x128xf32, #tpu.memory_space<vmem>>, vector<48x128xf32>
    tpu.vector_store %arg4[%c0_6, %c0_7], %7 {strides = array<i32>} : memref<48x128xf32, #tpu.memory_space<vmem>>, vector<48x128xf32>,
    return
  }
  func.func @transform_0(%arg0: i32) -> (i32, i32) {
    %c0_i32 = arith.constant 0 : i32
    %c0_i32_0 = arith.constant 0 : i32
    %c0_i32_1 = arith.constant 0 : i32
    return %c0_i32, %c0_i32_0 : i32, i32
  }
  func.func @transform_1(%arg0: i32) -> (i32, i32) {
    %c0_i32 = arith.constant 0 : i32
    %c0_i32_0 = arith.constant 0 : i32
    return %c0_i32, %arg0 : i32, i32
  }
  func.func @transform_2(%arg0: i32) -> (i32, i32) {
    %c0_i32 = arith.constant 0 : i32
    %c0_i32_0 = arith.constant 0 : i32
    return %c0_i32, %arg0 : i32, i32
  }
  func.func @transform_3(%arg0: i32) -> (i32, i32) {
    %c0_i32 = arith.constant 0 : i32
    %c0_i32_0 = arith.constant 0 : i32
    return %c0_i32, %arg0 : i32, i32
  }
}

</mosaic_0001>

<bundles_post_ra>
// kernel: tpu_custom_call.1
= control target key start
LH: loop header
LB: loop body
LE: loop exit
PB: predicated region body
PF: predicated region fallthrough
CT: control target
= control target key end

     0   :  { %8 = vsyncpa [#allocation3], 0  ;;  %s518_s0 = inlined_call_operand.hbm [shape: bf16[48,256], index: 0, kind: input, shape index: {}]   ;;  %s519_s1 = inlined_call_operand.hbm [shape: bf16[256,128], index: 1, kind: input, shape index: {}]   ;;  %s520_s2 = inlined_call_operand.vmem [shape: f32[1,128], index: 2, kind: input, shape index: {}]   ;;  %s521_s3 = inlined_call_operand.hbm [shape: f32[48,128], index: 3, kind: output, shape index: {}]  }
   0x1   :  { %9 = vsyncpa [#allocation6], 0 }
   0x2   :  { %10 = vsyncpa [#allocation4], 0  ;;  %s473_s12 = smov [#allocation2]  }
   0x3   :  { %s16_s13 = sshll.u32 %s473_s12, 4  ;;  %s17_s13 = int_to_ptr.vmem [resolvable:$true] %s16_s13 }
   0x4   :  { %s415_s14 = scalar_lea.vmem %s17_s13, 768  ;;  %p420_p1 = scmp.lt.s32.totalorder %s17_s13, %s17_s13 }
   0x5   :  { %p416_p0 = scmp.ne.s32.totalorder %s17_s13, %s415_s14  ;;  %p421_p2 = scmp.lt.s32.totalorder %s415_s14, %s415_s14 }
   0x7   :  { %p422_p3 = por %p421_p2, %p420_p1 }
   0x9   :  { %p423_p4 = pnand %p422_p3, %p416_p0 }
   0xb   :  { %426 = shalt.err (!%p423_p4)
}
   0xc   :  { %s474_s15 = smov 128   ;;  %s475_s16 = smov 8  }
   0xd   :  { %22 = dma.hbm_to_vmem [thread:$0]  %s518_s0, 768, %s17_s13, [#allocation3], %s474_s15, %s474_s15, %s475_s16  }
   0xe   :  { %s476_s19 = smov [#allocation5]  }
   0xf   :  { %s28_s20 = sshll.u32 %s476_s19, 4  ;;  %s29_s20 = int_to_ptr.vmem [resolvable:$true] %s28_s20 }
  0x10   :  { %s435_s21 = scalar_lea.vmem %s29_s20, 2048  ;;  %p440_p6 = scmp.lt.s32.totalorder %s29_s20, %s29_s20 }
  0x11   :  { %p436_p5 = scmp.ne.s32.totalorder %s29_s20, %s435_s21  ;;  %p441_p7 = scmp.lt.s32.totalorder %s435_s21, %s435_s21 }
  0x13   :  { %p442_p8 = por %p441_p7, %p440_p6 }
  0x15   :  { %p443_p9 = pnand %p442_p8, %p436_p5 }
  0x17   :  { %446 = shalt.err (!%p443_p9)
}
  0x18   :  { %s477_s22 = smov 64   ;;  %s478_s23 = smov 4  }
  0x19   :  { %34 = dma.hbm_to_vmem [thread:$0]  %s519_s1, 2048, %s29_s20, [#allocation6], %s477_s22, %s477_s22, %s478_s23  }
  0x1a   :  { %467 = dma.done.wait [#allocation3], 768  }
  0x1b   :  { %468 = vsyncadd [#allocation3], 4294966528 }
  0x1c   :  { %469 = dma.done.wait [#allocation6], 2048  }
  0x1d   :  { %470 = vsyncadd [#allocation6], 4294965248  ;;  %v382_v0 = vld [vmem:[#allocation5 + $0x78] sm:$0xff]   ;;  %v384_v2 = vld [vmem:[#allocation5 + $0x70] sm:$0xff]  }
  0x1e   :  { %v383_v1 = vld [vmem:[#allocation5 + $0x38] sm:$0xff]   ;;  %359 = vmatprep.subr.bf16.mxu1 %v382_v0  ;;  %325 = vmatprep.subr.bf16.mxu0 %v382_v0  ;;  %v385_v3 = vld [vmem:[#allocation5 + $0x30] sm:$0xff]   ;;  %v386_v4 = vld [vmem:[#allocation5 + $0x68] sm:$0xff]  }
  0x1f   :  { %367 = vmatpush3.bf16.msra.mxu1 %v383_v1  ;;  %326 = vmatpush3.bf16.msra.mxu0 %v383_v1  ;;  %v387_v5 = vld [vmem:[#allocation5 + $0x28] sm:$0xff]   ;;  %v388_v6 = vld [vmem:[#allocation5 + $0x60] sm:$0xff]   ;;  %v390_v8 = vld [vmem:[#allocation5 + $0x58] sm:$0xff]  }
  0x20   :  { %360 = vmatprep.subr.bf16.mxu1 %v384_v2  ;;  %327 = vmatprep.subr.bf16.mxu0 %v384_v2  ;;  %v389_v7 = vld [vmem:[#allocation5 + $0x20] sm:$0xff]   ;;  %v391_v9 = vld [vmem:[#allocation5 + $0x18] sm:$0xff]   ;;  %v392_v10 = vld [vmem:[#allocation5 + $0x50] sm:$0xff]  }
  0x21   :  { %v400_v11 = vld [vmem:[#allocation2 + $0x14] ss:$8 sps:$4 sm:$0xff]   ;;  %v403_v12 = vld [vmem:[#allocation2 + $0x4] ss:$8 sps:$4 sm:$0xff]   ;;  %v398_v18 = vld [vmem:[#allocation2 + $0x10] ss:$8 sps:$4 sm:$0xff]  }
  0x22   :  { %v393_v13 = vld [vmem:[#allocation5 + $0x10] sm:$0xff]   ;;  %v394_v14 = vld [vmem:[#allocation5 + $0x48] sm:$0xff]   ;;  %255 = vmatprep.mubr.bf16.mxu1 %v400_v11  ;;  %247 = vmatprep.mubr.bf16.mxu0 %v403_v12  ;;  %v396_v16 = vld [vmem:[#allocation5 + $0x40] sm:$0xff]  }
  0x23   :  { %368 = vmatpush3.bf16.msra.mxu1 %v385_v3  ;;  %328 = vmatpush3.bf16.msra.mxu0 %v385_v3  ;;  %v395_v15 = vld [vmem:[#allocation5 + $0x8] sm:$0xff]   ;;  %v397_v17 = vld [vmem:[#allocation5] sm:$0xff]   ;;  %v401_v19 = vld [vmem:[#allocation2] ss:$8 sps:$4 sm:$0xff]  }
  0x24   :  { %361 = vmatprep.subr.bf16.mxu1 %v386_v4  ;;  %329 = vmatprep.subr.bf16.mxu0 %v386_v4  ;;  %v404_v20 = vld [vmem:[#allocation2 + $0x24] ss:$8 sps:$4 sm:$0xff]   ;;  %v406_v21 = vld [vmem:[#allocation2 + $0x20] ss:$8 sps:$4 sm:$0xff]  }
  0x25   :  { %v302_v24 = vld [vmem:[%s520_s2] ss:$0 sm:$0xff]  ;;  %s479_s2 = smov [#allocation7]  }
  0x26   :  { %s289_s26 = sshll.u32 %s479_s2, 4  ;;  %s290_s26 = int_to_ptr.vmem [resolvable:$true] %s289_s26 }
  0x27   :  { %369 = vmatpush3.bf16.msra.mxu1 %v387_v5  ;;  %330 = vmatpush3.bf16.msra.mxu0 %v387_v5  ;;  %s447_s27 = scalar_lea.vmem %s290_s26, 768  ;;  %p452_p11 = scmp.lt.s32.totalorder %s290_s26, %s290_s26 }
  0x28   :  { %362 = vmatprep.subr.bf16.mxu1 %v388_v6  ;;  %331 = vmatprep.subr.bf16.mxu0 %v388_v6  ;;  %p448_p10 = scmp.ne.s32.totalorder %s290_s26, %s447_s27  ;;  %p453_p12 = scmp.lt.s32.totalorder %s447_s27, %s447_s27 }
  0x2a   :  { %p454_p13 = por %p453_p12, %p452_p11 }
  0x2b   :  { %370 = vmatpush3.bf16.msra.mxu1 %v389_v7  ;;  %332 = vmatpush3.bf16.msra.mxu0 %v389_v7 }
  0x2c   :  { %363 = vmatprep.subr.bf16.mxu1 %v390_v8  ;;  %333 = vmatprep.subr.bf16.mxu0 %v390_v8  ;;  %p455_p0 = pnand %p454_p13, %p448_p10 }
  0x2f   :  { %371 = vmatpush3.bf16.msra.mxu1 %v391_v9  ;;  %334 = vmatpush3.bf16.msra.mxu0 %v391_v9 }
  0x30   :  { %364 = vmatprep.subr.bf16.mxu1 %v392_v10  ;;  %335 = vmatprep.subr.bf16.mxu0 %v392_v10 }
  0x33   :  { %372 = vmatpush3.bf16.msra.mxu1 %v393_v13  ;;  %336 = vmatpush3.bf16.msra.mxu0 %v393_v13 }
  0x34   :  { %365 = vmatprep.subr.bf16.mxu1 %v394_v14  ;;  %337 = vmatprep.subr.bf16.mxu0 %v394_v14 }
  0x37   :  { %373 = vmatpush3.bf16.msra.mxu1 %v395_v15  ;;  %338 = vmatpush3.bf16.msra.mxu0 %v395_v15 }
  0x38   :  { %366 = vmatprep.subr.bf16.mxu1 %v396_v16  ;;  %339 = vmatprep.subr.bf16.mxu0 %v396_v16 }
  0x3b   :  { %374 = vmatpush3.bf16.msra.mxu1 %v397_v17  ;;  %340 = vmatpush3.bf16.msra.mxu0 %v397_v17 }
  0x3e   :  { %256 = vmatmul.mubr.bf16.vlgmr.msra.gmra.mxu1 %v398_v18  ;;  %248 = vmatmul.mubr.bf16.vlgmr.msra.gmra.mxu0 %v401_v19 }
  0x3f   :  { %263 = vmatprep.mubr.bf16.mxu1 %v404_v20 }
  0x46   :  { %264 = vmatmul.mubr.bf16.gmra.mxu1 %v406_v21 }
  0xfe   :  { %v347_v22 = vpop.f32.mrf.mxu1  ;;  %v341_v23 = vpop.f32.mrf.mxu0 }
 0x100   :  { %v348_v25 = vpop.f32.mrf.mxu1  ;;  %v342_v26 = vpop.f32.mrf.mxu0 }
 0x101   :  { %v349_v27 = vadd.f32 %v348_v25, %v347_v22  ;;  %v343_v28 = vadd.f32 %v342_v26, %v341_v23 }
 0x102   :  { %v350_v29 = vpop.f32.mrf.mxu1  ;;  %v344_v30 = vpop.f32.mrf.mxu0 }
 0x103   :  { %v258_v31 = vadd.f32 %v349_v27, %v302_v24  ;;  %v250_v32 = vadd.f32 %v343_v28, %v302_v24 }
 0x104   :  { %v351_v33 = vpop.f32.mrf.mxu1  ;;  %v345_v34 = vpop.f32.mrf.mxu0 }
 0x105   :  { %v274_v35 = vmax.f32 %v258_v31, 0.0  ;;  %v272_v36 = vmax.f32 %v250_v32, 0.0  ;;  %v352_v37 = vadd.f32 %v351_v33, %v350_v29  ;;  %v346_v38 = vadd.f32 %v345_v34, %v344_v30 }
 0x106   :  { %v353_v39 = vpop.f32.mrf.mxu1 }
 0x107   :  { %280 = vst [vmem:[#allocation7 + $0x10] sm:$0xff] %v274_v35  ;;  %278 = vst [vmem:[#allocation7] sm:$0xff] %v272_v36  ;;  %v261_v40 = vadd.f32 %v352_v37, %v302_v24  ;;  %v253_v41 = vadd.f32 %v346_v38, %v302_v24 }
 0x108   :  { %v354_v42 = vpop.f32.mrf.mxu1 }
 0x109   :  { %v275_v43 = vmax.f32 %v261_v40, 0.0  ;;  %v273_v44 = vmax.f32 %v253_v41, 0.0  ;;  %v355_v45 = vadd.f32 %v354_v42, %v353_v39 }
 0x10a   :  { %v356_v46 = vpop.f32.mrf.mxu1 }
 0x10b   :  { %281 = vst [vmem:[#allocation7 + $0x18] sm:$0xff] %v275_v43  ;;  %279 = vst [vmem:[#allocation7 + $0x8] sm:$0xff] %v273_v44  ;;  %v266_v47 = vadd.f32 %v355_v45, %v302_v24 }
 0x10c   :  { %v357_v48 = vpop.f32.mrf.mxu1 }
 0x10d   :  { %v276_v49 = vmax.f32 %v266_v47, 0.0  ;;  %v358_v50 = vadd.f32 %v357_v48, %v356_v46 }
 0x10f   :  { %282 = vst [vmem:[#allocation7 + $0x20] sm:$0xff] %v276_v49  ;;  %v269_v51 = vadd.f32 %v358_v50, %v302_v24 }
 0x111   :  { %v277_v52 = vmax.f32 %v269_v51, 0.0 }
 0x113   :  { %283 = vst [vmem:[#allocation7 + $0x28] sm:$0xff] %v277_v52 }
 0x114   :  { %458 = shalt.err (!%p455_p0)
}
 0x115   :  { %295 = dma.vmem_to_hbm [thread:$0]  %s290_s26, 768, %s521_s3, [#allocation4], %s474_s15, %s474_s15, %s475_s16  }
 0x116   :  { %471 = dma.done.wait [#allocation4], 768  }
 0x117   :  { %472 = vsyncadd [#allocation4], 4294966528 }
 0x118   :  { %299 = vsyncpa [#allocation3], 1 }
 0x119   :  { %300 = vsyncpa [#allocation6], 1 }
 0x11a   :  { %301 = vsyncpa [#allocation4], 1 }

</bundles_post_ra>
